<compile_context>
chip_gen: v6e
topology: v6e:2x2x1
jax: 0.10.0
libtpu: 0.0.40
codegen_flags: <defaults>
</compile_context>

<pallas_src>
import functools
import numpy as np
import jax
import jax.numpy as jnp
from jax import lax
from jax.experimental import pallas as pl
from jax.experimental.pallas import tpu as pltpu


# ----------------------------- tiling helpers -----------------------------

def _pick_tile(dim, pref, quantum):
    """Largest multiple of `quantum` <= pref that divides dim, else dim itself."""
    if dim <= pref:
        return dim
    t = (pref // quantum) * quantum
    while t >= quantum:
        if dim % t == 0:
            return t
        t -= quantum
    return dim


def _gelu_new(y):
    # GPT-2 "gelu_new" (tanh approximation); tanh goes to the EUP slot.
    return 0.5 * y * (1.0 + jnp.tanh(0.7978845608028654 * (y + 0.044715 * y * y * y)))


# ----------------------------- Pallas kernels -----------------------------

def _layernorm_kernel(x_ref, g_ref, b_ref, o_ref, *, eps):
    x = x_ref[...].astype(jnp.float32)
    mean = jnp.mean(x, axis=-1, keepdims=True)
    var = jnp.mean(jnp.square(x - mean), axis=-1, keepdims=True)
    xhat = (x - mean) * lax.rsqrt(var + eps)
    o_ref[...] = (xhat * g_ref[...] + b_ref[...]).astype(o_ref.dtype)


def _ln_matmul_kernel(x_ref, g_ref, b_ref, w_ref, bias_ref, o_ref, *, eps, activation):
    # LayerNorm fused into the projection: K (hidden dim) is NOT tiled so the
    # per-row statistics are exact.
    x = x_ref[...].astype(jnp.float32)
    mean = jnp.mean(x, axis=-1, keepdims=True)
    var = jnp.mean(jnp.square(x - mean), axis=-1, keepdims=True)
    xn = (x - mean) * lax.rsqrt(var + eps)
    xn = xn * g_ref[...] + b_ref[...]
    y = jnp.dot(xn.astype(jnp.bfloat16), w_ref[...].astype(jnp.bfloat16),
                preferred_element_type=jnp.float32)
    y = y + bias_ref[...].astype(jnp.float32)
    if activation == "gelu_new":
        y = _gelu_new(y)
    o_ref[...] = y.astype(o_ref.dtype)


def _matmul_resid_kernel(x_ref, w_ref, bias_ref, *rest, activation, has_residual):
    # Tiled matmul with f32 VMEM accumulator; bias folded into the k==0 init,
    # optional fused gelu/residual in the epilogue (last k step).
    if has_residual:
        res_ref, o_ref, acc_ref = rest
    else:
        o_ref, acc_ref = rest
    k = pl.program_id(2)

    @pl.when(k == 0)
    def _():
        acc_ref[...] = jnp.broadcast_to(bias_ref[...].astype(jnp.float32),
                                        acc_ref.shape)

    acc_ref[...] += jnp.dot(x_ref[...].astype(jnp.bfloat16),
                            w_ref[...].astype(jnp.bfloat16),
                            preferred_element_type=jnp.float32)

    @pl.when(k == pl.num_programs(2) - 1)
    def _():
        y = acc_ref[...]
        if activation == "gelu_new":
            y = _gelu_new(y)
        if has_residual:
            y = y + res_ref[...].astype(jnp.float32)
        o_ref[...] = y.astype(o_ref.dtype)


def _lm_head_kernel(x_ref, w_ref, o_ref, acc_ref):
    # logits = x @ wte.T, wte used directly as (V, D): contract on last dims.
    k = pl.program_id(2)

    @pl.when(k == 0)
    def _():
        acc_ref[...] = jnp.zeros_like(acc_ref)

    acc_ref[...] += lax.dot_general(
        x_ref[...].astype(jnp.bfloat16), w_ref[...].astype(jnp.bfloat16),
        (((1,), (1,)), ((), ())), preferred_element_type=jnp.float32)

    @pl.when(k == pl.num_programs(2) - 1)
    def _():
        o_ref[...] = acc_ref[...].astype(o_ref.dtype)


def _attention_kernel(q_ref, k_ref, v_ref, o_ref, p_ref, *, scale):
    # one (batch, head, q-tile) per grid step; K/V blocks stay resident across q.
    qi = pl.program_id(2)
    tq = q_ref.shape[2]
    q = q_ref[0, 0].astype(jnp.bfloat16)            # (tq, Dh)
    k = k_ref[0, 0].astype(jnp.bfloat16)            # (T, Dh)
    v = v_ref[0, 0].astype(jnp.bfloat16)            # (T, Dh)
    s = lax.dot_general(q, k, (((1,), (1,)), ((), ())),
                        preferred_element_type=jnp.float32) * scale     # (tq, T)
    T = s.shape[1]
    row = qi * tq + lax.broadcasted_iota(jnp.int32, (tq, T), 0)
    col = lax.broadcasted_iota(jnp.int32, (tq, T), 1)
    s = jnp.where(col <= row, s, -1e30)             # causal mask
    s = s - jnp.max(s, axis=-1, keepdims=True)
    e = jnp.exp(s)
    p = e * pl.reciprocal(jnp.sum(e, axis=-1, keepdims=True), approx=True)
    o = jnp.dot(p.astype(jnp.bfloat16), v, preferred_element_type=jnp.float32)
    o_ref[0, 0] = o.astype(o_ref.dtype)
    p_ref[0, 0] = p.astype(p_ref.dtype)


# ----------------------------- Pallas wrappers -----------------------------

_VMEM_LIMIT = 48 * 1024 * 1024   # safe on v5e/v6e (128 MiB) and v7x (64 MiB)


def pallas_layernorm(x2d, g, b, eps=1e-5, tm_pref=512):
    M, D = x2d.shape
    tm = _pick_tile(M, tm_pref, 8)
    return pl.pallas_call(
        functools.partial(_layernorm_kernel, eps=eps),
        out_shape=jax.ShapeDtypeStruct((M, D), x2d.dtype),
        grid=(M // tm,),
        in_specs=[pl.BlockSpec((tm, D), lambda i: (i, 0)),
                  pl.BlockSpec((1, D), lambda i: (0, 0)),
                  pl.BlockSpec((1, D), lambda i: (0, 0))],
        out_specs=pl.BlockSpec((tm, D), lambda i: (i, 0)),
        compiler_params=pltpu.CompilerParams(
            dimension_semantics=("parallel",)),
    )(x2d, g.reshape(1, D), b.reshape(1, D))


def pallas_ln_linear(x2d, g, b, w, bias, activation=None, eps=1e-5,
                     tm_pref=256, tn_pref=256):
    """LayerNorm(x) @ w + bias (+ gelu_new).  K untiled (needed for exact LN);
    the (tm, K) x-block index is constant across the n axis so it stays
    VMEM-resident while n sweeps."""
    M, K = x2d.shape
    K2, N = w.shape
    assert K == K2
    tm = _pick_tile(M, tm_pref, 8)
    tn = _pick_tile(N, tn_pref, 128)
    grid = (M // tm, N // tn)
    cost = pl.CostEstimate(
        flops=2 * M * N * K + 10 * M * K,
        transcendentals=(M * N if activation == "gelu_new" else 0),
        bytes_accessed=4 * (M * K + K * N + M * N))
    return pl.pallas_call(
        functools.partial(_ln_matmul_kernel, eps=eps, activation=activation),
        out_shape=jax.ShapeDtypeStruct((M, N), x2d.dtype),
        grid=grid,
        in_specs=[pl.BlockSpec((tm, K), lambda m, n: (m, 0)),
                  pl.BlockSpec((1, K), lambda m, n: (0, 0)),
                  pl.BlockSpec((1, K), lambda m, n: (0, 0)),
                  pl.BlockSpec((K, tn), lambda m, n: (0, n)),
                  pl.BlockSpec((1, tn), lambda m, n: (0, n))],
        out_specs=pl.BlockSpec((tm, tn), lambda m, n: (m, n)),
        compiler_params=pltpu.CompilerParams(
            dimension_semantics=("parallel", "parallel"),
            vmem_limit_bytes=_VMEM_LIMIT),
        cost_estimate=cost,
    )(x2d, g.reshape(1, K), b.reshape(1, K), w, bias.reshape(1, N))


def pallas_linear(x2d, w, bias, residual=None, activation=None,
                  tm_pref=256, tn_pref=256, tk_pref=512):
    """Tiled x @ w + bias (+ activation) (+ fused residual add)."""
    M, K = x2d.shape
    K2, N = w.shape
    assert K == K2
    tm = _pick_tile(M, tm_pref, 8)
    tn = _pick_tile(N, tn_pref, 128)
    tk = _pick_tile(K, tk_pref, 128)
    grid = (M // tm, N // tn, K // tk)
    has_residual = residual is not None

    in_specs = [pl.BlockSpec((tm, tk), lambda m, n, k: (m, k)),
                pl.BlockSpec((tk, tn), lambda m, n, k: (k, n)),
                pl.BlockSpec((1, tn), lambda m, n, k: (0, n))]
    args = [x2d, w, bias.reshape(1, N)]
    if has_residual:
        in_specs.append(pl.BlockSpec((tm, tn), lambda m, n, k: (m, n)))
        args.append(residual)

    cost = pl.CostEstimate(
        flops=2 * M * N * K,
        transcendentals=(M * N if activation == "gelu_new" else 0),
        bytes_accessed=4 * (M * K * (N // tn) + K * N * (M // tm) + M * N))

    return pl.pallas_call(
        functools.partial(_matmul_resid_kernel, activation=activation,
                          has_residual=has_residual),
        out_shape=jax.ShapeDtypeStruct((M, N), x2d.dtype),
        grid=grid,
        in_specs=in_specs,
        out_specs=pl.BlockSpec((tm, tn), lambda m, n, k: (m, n)),
        scratch_shapes=[pltpu.VMEM((tm, tn), jnp.float32)],
        compiler_params=pltpu.CompilerParams(
            dimension_semantics=("parallel", "parallel", "arbitrary"),
            vmem_limit_bytes=_VMEM_LIMIT),
        cost_estimate=cost,
    )(*args)


def pallas_lm_head(x2d, wte, tm_pref=256, tn_pref=512, tk_pref=512):
    """logits = x @ wte.T, using wte (V, D) directly (no transpose copy), no bias."""
    M, K = x2d.shape
    V, K2 = wte.shape
    assert K == K2
    if V <= tn_pref:
        Vp, tn, w = V, V, wte          # single lane-dense N block, no padding needed
    else:
        Vp = ((V + 127) // 128) * 128  # pad vocab to a multiple of 128 for tiling
        w = jnp.pad(wte, ((0, Vp - V), (0, 0))) if Vp != V else wte
        tn = _pick_tile(Vp, tn_pref, 128)
    tm = _pick_tile(M, tm_pref, 8)
    tk = _pick_tile(K, tk_pref, 128)
    grid = (M // tm, Vp // tn, K // tk)
    cost = pl.CostEstimate(
        flops=2 * M * Vp * K, transcendentals=0,
        bytes_accessed=4 * (M * K * (Vp // tn) + Vp * K + M * Vp))
    out = pl.pallas_call(
        _lm_head_kernel,
        out_shape=jax.ShapeDtypeStruct((M, Vp), x2d.dtype),
        grid=grid,
        in_specs=[pl.BlockSpec((tm, tk), lambda m, n, k: (m, k)),
                  pl.BlockSpec((tn, tk), lambda m, n, k: (n, k))],
        out_specs=pl.BlockSpec((tm, tn), lambda m, n, k: (m, n)),
        scratch_shapes=[pltpu.VMEM((tm, tn), jnp.float32)],
        compiler_params=pltpu.CompilerParams(
            dimension_semantics=("parallel", "parallel", "arbitrary"),
            vmem_limit_bytes=_VMEM_LIMIT),
        cost_estimate=cost,
    )(x2d, w)
    return out[:, :V] if Vp != V else out


def pallas_attention(q, k, v):
    # q, k, v: (B, H, T, Dh); tiled over query rows.
    B, H, T, Dh = q.shape
    scale = 1.0 / float(np.sqrt(Dh))
    tq = _pick_tile(T, 128, 8)
    grid = (B, H, T // tq)
    out, probs = pl.pallas_call(
        functools.partial(_attention_kernel, scale=scale),
        out_shape=(jax.ShapeDtypeStruct((B, H, T, Dh), q.dtype),
                   jax.ShapeDtypeStruct((B, H, T, T), jnp.float32)),
        grid=grid,
        in_specs=[pl.BlockSpec((1, 1, tq, Dh), lambda b, h, i: (b, h, i, 0)),
                  pl.BlockSpec((1, 1, T, Dh), lambda b, h, i: (b, h, 0, 0)),
                  pl.BlockSpec((1, 1, T, Dh), lambda b, h, i: (b, h, 0, 0))],
        out_specs=(pl.BlockSpec((1, 1, tq, Dh), lambda b, h, i: (b, h, i, 0)),
                   pl.BlockSpec((1, 1, tq, T), lambda b, h, i: (b, h, i, 0))),
        compiler_params=pltpu.CompilerParams(
            dimension_semantics=("parallel", "parallel", "arbitrary"),
            vmem_limit_bytes=_VMEM_LIMIT),
    )(q, k, v)
    return out, probs


# ----------------------------- GPT-2 forward -----------------------------

def gpt2_forward(params, input_ids):
    """Returns (lm_logits, all_hidden_states, all_attentions) like
    GPT2LMHeadModel(..., output_hidden_states=True, output_attentions=True)."""
    cfg = params["config"]
    B, T = input_ids.shape
    D, Hh = cfg["n_embd"], cfg["n_head"]
    Dh = D // Hh

    wte, wpe = params["wte"], params["wpe"]
    h = wte[input_ids] + wpe[jnp.arange(T)][None, :, :]        # (B, T, D)
    h2d = h.reshape(B * T, D)

    all_hidden, all_attn = [], []
    for layer in params["layers"]:
        all_hidden.append(h2d.reshape(B, T, D))

        # --- attention block (ln1 fused into the QKV projection) ---
        qkv = pallas_ln_linear(h2d, layer["ln1_g"], layer["ln1_b"],
                               layer["w_attn"], layer["b_attn"])        # (B*T, 3D)
        qkv = qkv.reshape(B, T, 3, Hh, Dh)
        # TODO(synk): reading q/k/v head slices straight from the (B*T, 3D) slab via
        # BlockSpec index_maps would remove these transposes, but Dh-wide column
        # blocks violate the (8,128) lane constraint, so keep XLA glue here.
        q = jnp.transpose(qkv[:, :, 0], (0, 2, 1, 3))                   # (B, Hh, T, Dh)
        k = jnp.transpose(qkv[:, :, 1], (0, 2, 1, 3))
        v = jnp.transpose(qkv[:, :, 2], (0, 2, 1, 3))
        attn, probs = pallas_attention(q, k, v)
        all_attn.append(probs)
        attn2d = jnp.transpose(attn, (0, 2, 1, 3)).reshape(B * T, D)
        # output projection with fused residual add
        h2d = pallas_linear(attn2d, layer["w_proj"], layer["b_proj"], residual=h2d)

        # --- MLP block (ln2 fused into the fc projection + gelu_new) ---
        fc = pallas_ln_linear(h2d, layer["ln2_g"], layer["ln2_b"],
                              layer["w_fc"], layer["b_fc"], activation="gelu_new")
        h2d = pallas_linear(fc, layer["w_mlp"], layer["b_mlp"], residual=h2d)

    hf = pallas_layernorm(h2d, params["lnf_g"], params["lnf_b"])
    all_hidden.append(hf.reshape(B, T, D))                     # HF appends ln_f output last

    # LM head: tied weights (logits = hf @ wte.T), no bias, wte used untransposed.
    logits = pallas_lm_head(hf, wte).reshape(B, T, -1)
    return logits, tuple(all_hidden), tuple(all_attn)


# ----------------------------- pure-JAX reference -----------------------------

def gpt2_reference(params, input_ids):
    cfg = params["config"]
    B, T = input_ids.shape
    D, Hh = cfg["n_embd"], cfg["n_head"]
    Dh = D // Hh

    def ln(x, g, b):
        m = jnp.mean(x, -1, keepdims=True)
        v = jnp.mean((x - m) ** 2, -1, keepdims=True)
        return (x - m) * lax.rsqrt(v + 1e-5) * g + b

    def gelu_new(x):
        return 0.5 * x * (1.0 + jnp.tanh(0.7978845608028654 * (x + 0.044715 * x ** 3)))

    h = params["wte"][input_ids] + params["wpe"][jnp.arange(T)][None]
    mask = jnp.tril(jnp.ones((T, T), bool))
    for layer in params["layers"]:
        a = ln(h, layer["ln1_g"], layer["ln1_b"])
        qkv = a @ layer["w_attn"] + layer["b_attn"]
        qkv = qkv.reshape(B, T, 3, Hh, Dh)
        q, k, v = (jnp.transpose(qkv[:, :, i], (0, 2, 1, 3)) for i in range(3))
        s = jnp.einsum("bhqd,bhkd->bhqk", q, k) / np.sqrt(Dh)
        s = jnp.where(mask, s, -1e9)
        p = jax.nn.softmax(s, -1)
        o = jnp.einsum("bhqk,bhkd->bhqd", p, v)
        o = jnp.transpose(o, (0, 2, 1, 3)).reshape(B, T, D)
        h = h + (o @ layer["w_proj"] + layer["b_proj"])
        a = ln(h, layer["ln2_g"], layer["ln2_b"])
        m = gelu_new(a @ layer["w_fc"] + layer["b_fc"])
        h = h + (m @ layer["w_mlp"] + layer["b_mlp"])
    hf = ln(h, params["lnf_g"], params["lnf_b"])
    return hf @ params["wte"].T


# ----------------------------- parameter init -----------------------------

def init_params(key, vocab, n_pos, n_embd, n_head, n_layer):
    keys = iter(jax.random.split(key, 4 + 4 * n_layer))
    std = 0.02
    p = {
        "config": {"n_embd": n_embd, "n_head": n_head, "n_layer": n_layer},
        "wte": jax.random.normal(next(keys), (vocab, n_embd), jnp.float32) * std,
        "wpe": jax.random.normal(next(keys), (n_pos, n_embd), jnp.float32) * std,
        "lnf_g": jnp.ones((n_embd,), jnp.float32),
        "lnf_b": jnp.zeros((n_embd,), jnp.float32),
        "layers": [],
    }
    for _ in range(n_layer):
        p["layers"].append({
            "ln1_g": jnp.ones((n_embd,), jnp.float32),
            "ln1_b": jnp.zeros((n_embd,), jnp.float32),
            # GPT-2 Conv1D layout: weight is (in_features, out_features)
            "w_attn": jax.random.normal(next(keys), (n_embd, 3 * n_embd), jnp.float32) * std,
            "b_attn": jnp.zeros((3 * n_embd,), jnp.float32),
            "w_proj": jax.random.normal(next(keys), (n_embd, n_embd), jnp.float32) * std,
            "b_proj": jnp.zeros((n_embd,), jnp.float32),
            "ln2_g": jnp.ones((n_embd,), jnp.float32),
            "ln2_b": jnp.zeros((n_embd,), jnp.float32),
            "w_fc": jax.random.normal(next(keys), (n_embd, 4 * n_embd), jnp.float32) * std,
            "b_fc": jnp.zeros((4 * n_embd,), jnp.float32),
            "w_mlp": jax.random.normal(next(keys), (4 * n_embd, n_embd), jnp.float32) * std,
            "b_mlp": jnp.zeros((n_embd,), jnp.float32),
        })
    return p


# ----------------------------- main -----------------------------

if __name__ == "__main__":
    # small GPT-2-style config
    VOCAB, N_POS, D, HEADS, LAYERS = 64, 16, 32, 2, 2
    B, T = 2, 8

    key = jax.random.PRNGKey(0)
    pkey, ikey = jax.random.split(key)
    params = init_params(pkey, VOCAB, N_POS, D, HEADS, LAYERS)
    input_ids = jax.random.randint(ikey, (B, T), 0, VOCAB, dtype=jnp.int32)

    logits, hidden_states, attentions = gpt2_forward(params, input_ids)
    jax.block_until_ready(logits)

    # sanity: shapes + agreement with pure-JAX f32 reference (kernels use bf16 MXU inputs)
    assert logits.shape == (B, T, VOCAB)
    assert len(hidden_states) == LAYERS + 1
    assert len(attentions) == LAYERS and attentions[0].shape == (B, HEADS, T, T)
    ref = gpt2_reference(params, input_ids)
    np.testing.assert_allclose(np.asarray(logits), np.asarray(ref), rtol=2e-2, atol=2e-2)

    print("KERNEL_OK")
</pallas_src>

<mosaic_0001>
module attributes {stable_mosaic.version = 11 : i64} {
  func.func @_ln_matmul_kernel(%arg0: i32, %arg1: i32, %arg2: memref<16x32xf32, #tpu.memory_space<vmem>>, %arg3: memref<1x32xf32, #tpu.memory_space<vmem>>, %arg4: memref<1x32xf32, #tpu.memory_space<vmem>>, %arg5: memref<32x96xf32, #tpu.memory_space<vmem>>, %arg6: memref<1x96xf32, #tpu.memory_space<vmem>>, %arg7: memref<16x96xf32, #tpu.memory_space<vmem>>) attributes {dimension_semantics = [#tpu.dimension_semantics<parallel>, #tpu.dimension_semantics<parallel>], iteration_bounds = array<i64: 1, 1>, scalar_prefetch = 0 : i64, scratch_operands = 0 : i64, tpu.core_type = #tpu.core_type<tc>, window_params = [{transform_indices = @transform_0, window_bounds = array<i64: 16, 32>}, {pipeline_mode = #tpu.pipeline_mode<synchronous>, transform_indices = @transform_1, window_bounds = array<i64: 1, 32>}, {pipeline_mode = #tpu.pipeline_mode<synchronous>, transform_indices = @transform_2, window_bounds = array<i64: 1, 32>}, {transform_indices = @transform_3, window_bounds = array<i64: 32, 96>}, {transform_indices = @transform_4, window_bounds = array<i64: 1, 96>}, {transform_indices = @transform_5, window_bounds = array<i64: 16, 96>}]} {
    %c0 = arith.constant 0 : index
    %c0_0 = arith.constant 0 : index
    %0 = vector.load %arg2[%c0, %c0_0] : memref<16x32xf32, #tpu.memory_space<vmem>>, vector<16x32xf32>
    %cst = arith.constant dense<0.000000e+00> : vector<16xf32>
    %1 = vector.multi_reduction <add>, %0, %cst [1] : vector<16x32xf32> to vector<16xf32>
    %2 = vector.shape_cast %1 : vector<16xf32> to vector<16x1xf32>
    %cst_1 = arith.constant 3.200000e+01 : f32
    %3 = vector.broadcast %cst_1 : f32 to vector<16x1xf32>
    %4 = arith.divf %2, %3 : vector<16x1xf32>
    %5 = vector.broadcast %4 : vector<16x1xf32> to vector<16x32xf32>
    %6 = arith.subf %0, %5 : vector<16x32xf32>
    %7 = arith.mulf %6, %6 : vector<16x32xf32>
    %cst_2 = arith.constant dense<0.000000e+00> : vector<16xf32>
    %8 = vector.multi_reduction <add>, %7, %cst_2 [1] : vector<16x32xf32> to vector<16xf32>
    %9 = vector.shape_cast %8 : vector<16xf32> to vector<16x1xf32>
    %cst_3 = arith.constant 3.200000e+01 : f32
    %10 = vector.broadcast %cst_3 : f32 to vector<16x1xf32>
    %11 = arith.divf %9, %10 : vector<16x1xf32>
    %12 = vector.broadcast %4 : vector<16x1xf32> to vector<16x32xf32>
    %13 = arith.subf %0, %12 : vector<16x32xf32>
    %cst_4 = arith.constant 9.99999974E-6 : f32
    %14 = vector.broadcast %cst_4 : f32 to vector<16x1xf32>
    %15 = arith.addf %11, %14 : vector<16x1xf32>
    %16 = math.rsqrt %15 : vector<16x1xf32>
    %17 = vector.broadcast %16 : vector<16x1xf32> to vector<16x32xf32>
    %18 = arith.mulf %13, %17 : vector<16x32xf32>
    %c0_5 = arith.constant 0 : index
    %c0_6 = arith.constant 0 : index
    %19 = vector.load %arg3[%c0_5, %c0_6] : memref<1x32xf32, #tpu.memory_space<vmem>>, vector<1x32xf32>
    %20 = vector.broadcast %19 : vector<1x32xf32> to vector<16x32xf32>
    %21 = arith.mulf %18, %20 : vector<16x32xf32>
    %c0_7 = arith.constant 0 : index
    %c0_8 = arith.constant 0 : index
    %22 = vector.load %arg4[%c0_7, %c0_8] : memref<1x32xf32, #tpu.memory_space<vmem>>, vector<1x32xf32>
    %23 = vector.broadcast %22 : vector<1x32xf32> to vector<16x32xf32>
    %24 = arith.addf %21, %23 : vector<16x32xf32>
    %25 = arith.truncf %24 : vector<16x32xf32> to vector<16x32xbf16>
    %c0_9 = arith.constant 0 : index
    %c0_10 = arith.constant 0 : index
    %26 = vector.load %arg5[%c0_9, %c0_10] : memref<32x96xf32, #tpu.memory_space<vmem>>, vector<32x96xf32>
    %27 = arith.truncf %26 : vector<32x96xf32> to vector<32x96xbf16>
    %cst_11 = arith.constant dense<0.000000e+00> : vector<16x96xf32>
    %28 = tpu.matmul %25, %27, %cst_11 {dimension_numbers = #tpu.dot_dimension_numbers<[1], [0], [0], [1], [0, 0, 1, 1], [], []>} : vector<16x32xbf16>, vector<32x96xbf16>, vector<16x96xf32> -> vector<16x96xf32>
    %c0_12 = arith.constant 0 : index
    %c0_13 = arith.constant 0 : index
    %29 = vector.load %arg6[%c0_12, %c0_13] : memref<1x96xf32, #tpu.memory_space<vmem>>, vector<1x96xf32>
    %30 = vector.broadcast %29 : vector<1x96xf32> to vector<16x96xf32>
    %31 = arith.addf %28, %30 : vector<16x96xf32>
    %c0_14 = arith.constant 0 : index
    %c0_15 = arith.constant 0 : index
    %32 = vector.load %arg7[%c0_14, %c0_15] : memref<16x96xf32, #tpu.memory_space<vmem>>, vector<16x96xf32>
    tpu.vector_store %arg7[%c0_14, %c0_15], %31 {strides = array<i32>} : memref<16x96xf32, #tpu.memory_space<vmem>>, vector<16x96xf32>,
    return
  }
  func.func @transform_0(%arg0: i32, %arg1: i32) -> (i32, i32) {
    %c0_i32 = arith.constant 0 : i32
    %c0_i32_0 = arith.constant 0 : i32
    return %arg0, %c0_i32 : i32, i32
  }
  func.func @transform_1(%arg0: i32, %arg1: i32) -> (i32, i32) {
    %c0_i32 = arith.constant 0 : i32
    %c0_i32_0 = arith.constant 0 : i32
    %c0_i32_1 = arith.constant 0 : i32
    return %c0_i32, %c0_i32_0 : i32, i32
  }
  func.func @transform_2(%arg0: i32, %arg1: i32) -> (i32, i32) {
    %c0_i32 = arith.constant 0 : i32
    %c0_i32_0 = arith.constant 0 : i32
    %c0_i32_1 = arith.constant 0 : i32
    return %c0_i32, %c0_i32_0 : i32, i32
  }
  func.func @transform_3(%arg0: i32, %arg1: i32) -> (i32, i32) {
    %c0_i32 = arith.constant 0 : i32
    %c0_i32_0 = arith.constant 0 : i32
    return %c0_i32, %arg1 : i32, i32
  }
  func.func @transform_4(%arg0: i32, %arg1: i32) -> (i32, i32) {
    %c0_i32 = arith.constant 0 : i32
    %c0_i32_0 = arith.constant 0 : i32
    return %c0_i32, %arg1 : i32, i32
  }
  func.func @transform_5(%arg0: i32, %arg1: i32) -> (i32, i32) {
    %c0_i32 = arith.constant 0 : i32
    return %arg0, %arg1 : i32, i32
  }
}

</mosaic_0001>

<bundles_post_ra>
// kernel: tpu_custom_call.1
= control target key start
LH: loop header
LB: loop body
LE: loop exit
PB: predicated region body
PF: predicated region fallthrough
CT: control target
= control target key end

     0   :  { %10 = vsyncpa [#allocation3], 0  ;;  %s338_s0 = inlined_call_operand.hbm [shape: f32[16,32], index: 0, kind: input, shape index: {}]   ;;  %s339_s1 = inlined_call_operand.vmem [shape: f32[1,32], index: 1, kind: input, shape index: {}]   ;;  %s340_s2 = inlined_call_operand.vmem [shape: f32[1,32], index: 2, kind: input, shape index: {}]   ;;  %s341_s3 = inlined_call_operand.hbm [shape: f32[32,96], index: 3, kind: input, shape index: {}]   ;;  %s342_s4 = inlined_call_operand.vmem [shape: f32[1,96], index: 4, kind: input, shape index: {}]   ;;  %s343_s5 = inlined_call_operand.hbm [shape: f32[16,96], index: 5, kind: output, shape index: {}]  }
   0x1   :  { %11 = vsyncpa [#allocation6], 0 }
   0x2   :  { %12 = vsyncpa [#allocation4], 0  ;;  %s269_s18 = smov [#allocation2]  }
   0x3   :  { %s18_s19 = sshll.u32 %s269_s18, 4  ;;  %s19_s19 = int_to_ptr.vmem [resolvable:$true] %s18_s19 }
   0x4   :  { %s211_s20 = scalar_lea.vmem %s19_s19, 256  ;;  %p216_p1 = scmp.lt.s32.totalorder %s19_s19, %s19_s19 }
   0x5   :  { %p212_p0 = scmp.ne.s32.totalorder %s19_s19, %s211_s20  ;;  %p217_p2 = scmp.lt.s32.totalorder %s211_s20, %s211_s20 }
   0x7   :  { %p218_p3 = por %p217_p2, %p216_p1 }
   0x9   :  { %p219_p4 = pnand %p218_p3, %p212_p0 }
   0xb   :  { %222 = shalt.err (!%p219_p4)
}
   0xc   :  { %s270_s21 = smov 128   ;;  %s271_s22 = smov 8  }
   0xd   :  { %24 = dma.hbm_to_vmem [thread:$0]  %s338_s0, 256, %s19_s19, [#allocation3], %s270_s21, %s270_s21, %s271_s22  }
   0xe   :  { %s272_s25 = smov [#allocation5]  }
   0xf   :  { %s34_s26 = sshll.u32 %s272_s25, 4  ;;  %s35_s26 = int_to_ptr.vmem [resolvable:$true] %s34_s26 }
  0x10   :  { %s231_s27 = scalar_lea.vmem %s35_s26, 512  ;;  %p236_p6 = scmp.lt.s32.totalorder %s35_s26, %s35_s26 }
  0x11   :  { %p232_p5 = scmp.ne.s32.totalorder %s35_s26, %s231_s27  ;;  %p237_p7 = scmp.lt.s32.totalorder %s231_s27, %s231_s27 }
  0x13   :  { %p238_p8 = por %p237_p7, %p236_p6 }
  0x15   :  { %p239_p9 = pnand %p238_p8, %p232_p5 }
  0x17   :  { %242 = shalt.err (!%p239_p9)
}
  0x18   :  { %40 = dma.hbm_to_vmem [thread:$0]  %s341_s3, 512, %s35_s26, [#allocation6], %s270_s21, %s270_s21, %s271_s22  }
  0x19   :  { %263 = dma.done.wait [#allocation3], 256  }
  0x1a   :  { %264 = vsyncadd [#allocation3], 4294967040 }
  0x1b   :  { %265 = dma.done.wait [#allocation6], 512  }
  0x1c   :  { %266 = vsyncadd [#allocation6], 4294966784  ;;  %vm52_vm0 = vcmask 261120   ;;  %v50_v0 = vld [vmem:[#allocation2] sm:$0xff]  ;;  %v51_v1 = vld [vmem:[#allocation2 + $0x8] sm:$0xff]  ;;  %v273_v17 = vmov 0.0  }
  0x1d   :  { %v53_v2 = vsel %vm52_vm0, %v50_v0, 0.0  ;;  %v56_v3 = vsel %vm52_vm0, %v51_v1, 0.0  ;;  %v101_v14 = vld [vmem:[#allocation5 + $0x10] sm:$0xff]  ;;  %v102_v15 = vld [vmem:[#allocation5 + $0x18] sm:$0xff]  ;;  %v99_v16 = vld [vmem:[#allocation5] sm:$0xff]  ;;  %184 = vmatprep.subr.bf16.mxu0 %v273_v17  ;;  %vm274_vm1 = vmmov 0  }
  0x1e   :  { %54 = vadd.xlane.f32.xlu0 %v53_v2  ;;  %v104_v18 = vpack.c.bf16 %v102_v15, %v101_v14  ;;  %v100_v19 = vld [vmem:[#allocation5 + $0x8] sm:$0xff]  ;;  %188 = vmatprep.mubr.msk.bf16.mxu0 %vm274_vm1, %v273_v17  ;;  %v177_v29 = vld [vmem:[%s339_s1] ss:$0 sm:$0xff]  ;;  %vm156_vm2 = vcmask 785408   ;;  %s275_s1 = smov [#allocation7]  }
  0x1f   :  { %v103_v20 = vpack.c.bf16 %v100_v19, %v99_v16  ;;  %v178_v33 = vld [vmem:[%s340_s2] ss:$0 sm:$0xff]  ;;  %s164_s9 = sshll.u32 %s275_s1, 4  ;;  %s165_s9 = int_to_ptr.vmem [resolvable:$true] %s164_s9 }
  0x20   :  { %185 = vmatpush3.bf16.msra.mxu0 %v104_v18  ;;  %v179_v38 = vld [vmem:[%s342_s4] ss:$0 sm:$0xff]  ;;  %s243_s2 = scalar_lea.vmem %s165_s9, 256  ;;  %p248_p11 = scmp.lt.s32.totalorder %s165_s9, %s165_s9 }
  0x21   :  { %186 = vmatprep.subr.bf16.mxu0 %v273_v17  ;;  %p244_p10 = scmp.ne.s32.totalorder %s165_s9, %s243_s2  ;;  %p249_p12 = scmp.lt.s32.totalorder %s243_s2, %s243_s2 }
  0x22   :  { %57 = vadd.xlane.f32.xlu0 %v56_v3 }
  0x23   :  { %p250_p13 = por %p249_p12, %p248_p11 }
  0x24   :  { %187 = vmatpush3.bf16.msra.mxu0 %v103_v20 }
  0x25   :  { %p251_p0 = pnand %p250_p13, %p244_p10 }
  0xa7   :  { %v55_v4 = vpop.xlane.xlu0 %54 }
  0xa8   :  { %v60_v5 = vmul.f32 0.03125, %v55_v4 }
  0xaa   :  { %v62_v6 = vsub.f32 %v50_v0, %v60_v5 }
  0xab   :  { %v58_v7 = vpop.xlane.xlu0 %57 }
  0xac   :  { %v61_v8 = vmul.f32 0.03125, %v58_v7  ;;  %v64_v9 = vmul.f32 %v62_v6, %v62_v6 }
  0xae   :  { %v63_v10 = vsub.f32 %v51_v1, %v61_v8  ;;  %v66_v11 = vsel %vm52_vm0, %v64_v9, 0.0 }
  0xaf   :  { %67 = vadd.xlane.f32.xlu1 %v66_v11 }
  0xb0   :  { %v65_v12 = vmul.f32 %v63_v10, %v63_v10 }
  0xb2   :  { %v69_v13 = vsel %vm52_vm0, %v65_v12, 0.0 }
  0xb3   :  { %70 = vadd.xlane.f32.xlu1 %v69_v13 }
 0x138   :  { %v68_v21 = vpop.xlane.xlu1 %67 }
 0x139   :  { %v72_v22 = vmul.f32 0.03125, %v68_v21 }
 0x13b   :  { %v74_v23 = vadd.f32 1e-05, %v72_v22 }
 0x13c   :  { %v71_v24 = vpop.xlane.xlu1 %70 }
 0x13d   :  { %199 = vrsqrt.f32 %v74_v23  ;;  %v73_v25 = vmul.f32 0.03125, %v71_v24 }
 0x13f   :  { %v75_v26 = vadd.f32 1e-05, %v73_v25 }
 0x141   :  { %201 = vrsqrt.f32 %v75_v26 }
 0x14a   :  { %v200_v27 = vpop.eup %199 }
 0x14b   :  { %v78_v28 = vmul.f32 %v200_v27, %v62_v6 }
 0x14d   :  { %v87_v32 = vmul.f32 %v177_v29, %v78_v28 }
 0x14e   :  { %v202_v30 = vpop.eup %201 }
 0x14f   :  { %v79_v31 = vmul.f32 %v202_v30, %v63_v10  ;;  %v96_v35 = vadd.f32 %v178_v33, %v87_v32 }
 0x151   :  { %v88_v34 = vmul.f32 %v177_v29, %v79_v31 }
 0x153   :  { %v97_v36 = vadd.f32 %v178_v33, %v88_v34 }
 0x155   :  { %v98_v37 = vpack.c.bf16 %v97_v36, %v96_v35 }
 0x157   :  { %189 = vmatmul.mubr.msk.bf16.vlgmr.msra.gmra.mxu0 %vm52_vm0, %v98_v37 }
 0x217   :  { %v149_v39 = vpop.f32.mrf.mxu0 }
 0x218   :  { %v150_v40 = vadd.f32 %v179_v38, %v149_v39 }
 0x219   :  { %v190_v41 = vpop.f32.mrf.mxu0 }
 0x21a   :  { %157 = vst.msk [vmem:[#allocation7] sm:$0xff] %vm156_vm2, %v150_v40 }
 0x21b   :  { %v152_v42 = vpop.f32.mrf.mxu0 }
 0x21c   :  { %v153_v43 = vadd.f32 %v179_v38, %v152_v42 }
 0x21d   :  { %v191_v44 = vpop.f32.mrf.mxu0 }
 0x21e   :  { %158 = vst.msk [vmem:[#allocation7 + $0x8] sm:$0xff] %vm156_vm2, %v153_v43 }
 0x21f   :  { %254 = shalt.err (!%p251_p0)
}
 0x220   :  { %170 = dma.vmem_to_hbm [thread:$0]  %s165_s9, 256, %s343_s5, [#allocation4], %s270_s21, %s270_s21, %s271_s22  }
 0x221   :  { %267 = dma.done.wait [#allocation4], 256  }
 0x222   :  { %268 = vsyncadd [#allocation4], 4294967040 }
 0x223   :  { %174 = vsyncpa [#allocation3], 1 }
 0x224   :  { %175 = vsyncpa [#allocation6], 1 }
 0x225   :  { %176 = vsyncpa [#allocation4], 1 }

</bundles_post_ra>
